<compile_context>
chip_gen: v7x
topology: tpu7x:2x2x1
jax: 0.10.0
libtpu: 0.0.40
codegen_flags: <defaults>
</compile_context>

<pallas_src>
import math

import jax
import jax.numpy as jnp
from jax.experimental import pallas as pl
from jax.experimental.pallas import tpu as pltpu

# ---- Module hyperparameters (small, consistent with the quantum GAN setup) --
N_QUBITS = 5
N_A_QUBITS = 1
Q_DEPTH = 6
N_GENERATORS = 4
Q_DELTA = 1.0
PATCH_SIZE = 2 ** (N_QUBITS - N_A_QUBITS)    # 16 kept probabilities per patch
DIM = 2 ** N_QUBITS                          # 32 statevector entries
OUT_W = N_GENERATORS * PATCH_SIZE            # 64 output features per row
PAIR_IN_W = 4 * N_QUBITS                     # 20 cos/sin lanes per row-pair
PAIR_OUT_W = 2 * OUT_W                       # 128 output lanes per row-pair


# ---------------------------- JAX glue (setup) -------------------------------
def _ry(theta):
    """2x2 RY(theta) matrix (real)."""
    c = jnp.cos(theta / 2.0)
    s = jnp.sin(theta / 2.0)
    return jnp.stack([jnp.stack([c, -s]), jnp.stack([s, c])]).astype(jnp.float32)


def _cz_chain_diag():
    """Diagonal of CZ gates on wires (q, q+1), wire 0 = most significant bit."""
    idx = jnp.arange(DIM)
    shifts = N_QUBITS - 1 - jnp.arange(N_QUBITS)
    bits = (idx[:, None] >> shifts[None, :]) & 1          # (DIM, N_QUBITS)
    d = jnp.ones((DIM,), dtype=jnp.float32)
    for q in range(N_QUBITS - 1):
        both = (bits[:, q] * bits[:, q + 1]).astype(jnp.float32)
        d = d * (1.0 - 2.0 * both)
    return d


def _circuit_unitary(weights):
    """Full (DIM, DIM) real unitary of one sub-generator; weights: (Q_DEPTH, N_QUBITS)."""
    cz_diag = _cz_chain_diag()
    u = jnp.eye(DIM, dtype=jnp.float32)
    for layer in range(Q_DEPTH):
        ry_layer = jnp.ones((1, 1), dtype=jnp.float32)
        for q in range(N_QUBITS):
            ry_layer = jnp.kron(ry_layer, _ry(weights[layer, q]))
        layer_u = cz_diag[:, None] * ry_layer              # CZ chain after RY layer
        u = layer_u @ u
    return u


def _initial_states(x):
    """Product state from RY(noise) on |0...0>: x (B, N_QUBITS) -> (B, DIM). (reference only)"""
    b = x.shape[0]
    c = jnp.cos(x / 2.0)
    s = jnp.sin(x / 2.0)
    psi = jnp.ones((b, 1), dtype=jnp.float32)
    for q in range(N_QUBITS):
        qvec = jnp.stack([c[:, q], s[:, q]], axis=-1)      # (B, 2)
        psi = (psi[:, :, None] * qvec[:, None, :]).reshape(b, -1)
    return psi.astype(jnp.float32)


# ------------------------------ Pallas kernel --------------------------------
def _patch_kernel(cs_ref, w_ref, out_ref):
    # cs_ref : (TBP, 20)  per row-pair: [cos_a(5), sin_a(5), cos_b(5), sin_b(5)]
    # w_ref  : (64, 128)  block-diagonal [[W, 0], [0, W]] with W = fused (32, 64)
    # out_ref: (TBP, 128) rows a|b of the final (2*TBP, 64) output, side by side
    cs = cs_ref[...]
    tbp = cs.shape[0]

    # In-kernel product-state construction for both rows of each pair.
    lane = jax.lax.broadcasted_iota(jnp.int32, (tbp, 2 * DIM), 1)   # 0..63
    half = lane >= DIM                      # lanes 0..31 -> row a, 32..63 -> row b
    local = lane & (DIM - 1)                # basis index within the 32-state block

    psi = jnp.ones((tbp, 2 * DIM), dtype=jnp.float32)
    for q in range(N_QUBITS):               # static, fully unrolled (VPU filler)
        bit = (local >> (N_QUBITS - 1 - q)) & 1
        c_a = cs[:, q:q + 1]
        s_a = cs[:, N_QUBITS + q:N_QUBITS + q + 1]
        c_b = cs[:, 2 * N_QUBITS + q:2 * N_QUBITS + q + 1]
        s_b = cs[:, 3 * N_QUBITS + q:3 * N_QUBITS + q + 1]
        c = jnp.where(half, c_b, c_a)       # (TBP, 64) lane-broadcast selects
        s = jnp.where(half, s_b, s_a)
        psi = psi * jnp.where(bit == 0, c, s)

    # One MXU matmul covers all generators for both rows: (TBP,64)@(64,128).
    amps = jnp.dot(psi, w_ref[...], preferred_element_type=jnp.float32)
    probs = amps * amps                     # kept-state probabilities

    # Per-patch max normalization (sum-normalization cancels algebraically).
    # 2 rows * N_GENERATORS = 8 patches of 16 lanes; single 128-lane store.
    pieces = []
    for p in range(2 * N_GENERATORS):
        pg = probs[:, p * PATCH_SIZE:(p + 1) * PATCH_SIZE]
        mx = jnp.max(pg, axis=-1, keepdims=True)            # XLU reduce
        inv = pl.reciprocal(jnp.maximum(mx, 1e-12), approx=True)  # EUP vrcp
        pieces.append(pg * inv)
    out_ref[...] = jnp.concatenate(pieces, axis=-1)


def patch_quantum_generator(x, q_params, *, tile_pairs=1024):
    """x: (B, N_QUBITS) float32 noise; q_params: list of (Q_DEPTH*N_QUBITS,) params.

    Returns (B, N_GENERATORS * PATCH_SIZE), generator-major along features,
    exactly like the torch.cat loop in forward().
    """
    b = x.shape[0]

    # Fused, pre-sliced weight: per generator take U^T's first PATCH_SIZE
    # columns (only amplitudes ever consumed), pack along lanes -> (32, 64),
    # then block-diagonal duplicate for the row-pair layout -> (64, 128).
    w = jnp.concatenate(
        [
            _circuit_unitary(p.reshape(Q_DEPTH, N_QUBITS)).T[:, :PATCH_SIZE]
            for p in q_params
        ],
        axis=1,
    ).astype(jnp.float32)
    w2 = jnp.zeros((2 * DIM, PAIR_OUT_W), jnp.float32)
    w2 = w2.at[:DIM, :OUT_W].set(w)
    w2 = w2.at[DIM:, OUT_W:].set(w)

    # Pad batch to an even count, then to whole sublane-aligned pair tiles.
    bp = -(-b // 2)
    bp_pad = ((bp + 7) // 8) * 8
    tbp = min(tile_pairs, bp_pad)           # both are multiples of 8
    bp_pad = ((bp_pad + tbp - 1) // tbp) * tbp
    b_pad = 2 * bp_pad

    # Only cos/sin of the noise are streamed to the kernel (~40 B/row).
    x_pad = jnp.zeros((b_pad, N_QUBITS), jnp.float32).at[:b].set(x.astype(jnp.float32))
    c = jnp.cos(0.5 * x_pad)
    s = jnp.sin(0.5 * x_pad)
    cs = jnp.concatenate([c, s], axis=1)                     # (b_pad, 10)
    cs_pairs = cs.reshape(bp_pad, PAIR_IN_W)                 # (bp_pad, 20), contiguous

    grid = (bp_pad // tbp,)
    out = pl.pallas_call(
        _patch_kernel,
        out_shape=jax.ShapeDtypeStruct((bp_pad, PAIR_OUT_W), jnp.float32),
        grid=grid,
        in_specs=[
            pl.BlockSpec((tbp, PAIR_IN_W), lambda i: (i, 0)),
            pl.BlockSpec((2 * DIM, PAIR_OUT_W), lambda i: (0, 0)),  # VMEM-resident weight
        ],
        out_specs=pl.BlockSpec((tbp, PAIR_OUT_W), lambda i: (i, 0)),
        compiler_params=pltpu.CompilerParams(
            dimension_semantics=("parallel",),               # megacore-shard the batch
        ),
        cost_estimate=pl.CostEstimate(
            flops=2 * bp_pad * (2 * DIM) * PAIR_OUT_W,
            transcendentals=bp_pad * 2 * N_GENERATORS,
            bytes_accessed=bp_pad * (PAIR_IN_W + PAIR_OUT_W) * 4
            + (2 * DIM) * PAIR_OUT_W * 4,
        ),
    )(cs_pairs, w2)

    # Contiguous view back to (rows, 64); drop batch padding.
    return out.reshape(b_pad, OUT_W)[:b]


# ------------------------------------ main -----------------------------------
if __name__ == "__main__":
    key = jax.random.PRNGKey(0)
    k_x, *k_params = jax.random.split(key, 1 + N_GENERATORS)

    batch = 8
    # latent noise in [0, pi/2), as in the quantum-GAN training loop
    x = jax.random.uniform(k_x, (batch, N_QUBITS), dtype=jnp.float32) * (math.pi / 2.0)

    # deterministic parameter init: q_delta * U[0,1) of shape (q_depth * n_qubits,)
    q_params = [
        Q_DELTA * jax.random.uniform(k, (Q_DEPTH * N_QUBITS,), dtype=jnp.float32)
        for k in k_params
    ]

    images = jax.jit(patch_quantum_generator)(x, q_params)
    images = jax.block_until_ready(images)

    assert images.shape == (batch, N_GENERATORS * PATCH_SIZE)
    assert images.dtype == jnp.float32

    # Plain-JAX reference of the original semantics (with the redundant
    # sum-normalization kept) for a numerical cross-check.
    psi0 = _initial_states(x)
    ref_patches = []
    for p in q_params:
        u = _circuit_unitary(p.reshape(Q_DEPTH, N_QUBITS))
        amps = psi0 @ u.T
        probs = amps * amps
        pg0 = probs[:, :PATCH_SIZE] / jnp.sum(probs, axis=-1, keepdims=True)
        ref_patches.append(pg0 / jnp.max(pg0, axis=-1, keepdims=True))
    ref = jnp.concatenate(ref_patches, axis=1)

    # approx reciprocal on the EUP gives ~1e-3-level relative error at most
    assert bool(jnp.allclose(images, ref, rtol=1e-2, atol=1e-2))
    # each patch is max-normalized, so per-patch max must be ~1
    patches = images.reshape(batch, N_GENERATORS, PATCH_SIZE)
    assert bool(jnp.allclose(jnp.max(patches, axis=-1), 1.0, atol=1e-2))

    print("KERNEL_OK")
</pallas_src>

<mosaic_0001>
module attributes {stable_mosaic.version = 11 : i64} {
  func.func @_patch_kernel(%arg0: i32, %arg1: memref<8x20xf32, #tpu.memory_space<vmem>>, %arg2: memref<64x128xf32, #tpu.memory_space<vmem>>, %arg3: memref<8x128xf32, #tpu.memory_space<vmem>>) attributes {dimension_semantics = [#tpu.dimension_semantics<parallel>], iteration_bounds = array<i64: 1>, scalar_prefetch = 0 : i64, scratch_operands = 0 : i64, tpu.core_type = #tpu.core_type<tc>, window_params = [{transform_indices = @transform_0, window_bounds = array<i64: 8, 20>}, {pipeline_mode = #tpu.pipeline_mode<synchronous>, transform_indices = @transform_1, window_bounds = array<i64: 64, 128>}, {transform_indices = @transform_2, window_bounds = array<i64: 8, 128>}]} {
    %c0 = arith.constant 0 : index
    %c0_0 = arith.constant 0 : index
    %0 = vector.load %arg1[%c0, %c0_0] : memref<8x20xf32, #tpu.memory_space<vmem>>, vector<8x20xf32>
    %1 = tpu.iota {dimensions = array<i32: 1>} : vector<8x64xi32>
    %c32_i32 = arith.constant 32 : i32
    %2 = vector.broadcast %c32_i32 : i32 to vector<8x64xi32>
    %3 = arith.cmpi sge, %1, %2 : vector<8x64xi32>
    %c31_i32 = arith.constant 31 : i32
    %4 = vector.broadcast %c31_i32 : i32 to vector<8x64xi32>
    %5 = arith.andi %1, %4 : vector<8x64xi32>
    %cst = arith.constant 1.000000e+00 : f32
    %6 = vector.broadcast %cst : f32 to vector<8x64xf32>
    %c4_i32 = arith.constant 4 : i32
    %7 = vector.broadcast %c4_i32 : i32 to vector<8x64xi32>
    %8 = arith.shrsi %5, %7 : vector<8x64xi32>
    %c1_i32 = arith.constant 1 : i32
    %9 = vector.broadcast %c1_i32 : i32 to vector<8x64xi32>
    %10 = arith.andi %8, %9 : vector<8x64xi32>
    %11 = vector.extract_strided_slice %0 {offsets = [0, 0], sizes = [8, 1], strides = [1, 1]} : vector<8x20xf32> to vector<8x1xf32>
    %12 = vector.extract_strided_slice %0 {offsets = [0, 5], sizes = [8, 1], strides = [1, 1]} : vector<8x20xf32> to vector<8x1xf32>
    %13 = vector.extract_strided_slice %0 {offsets = [0, 10], sizes = [8, 1], strides = [1, 1]} : vector<8x20xf32> to vector<8x1xf32>
    %14 = vector.extract_strided_slice %0 {offsets = [0, 15], sizes = [8, 1], strides = [1, 1]} : vector<8x20xf32> to vector<8x1xf32>
    %15 = vector.shape_cast %13 : vector<8x1xf32> to vector<8x1xf32>
    %16 = vector.broadcast %15 : vector<8x1xf32> to vector<8x64xf32>
    %17 = vector.shape_cast %11 : vector<8x1xf32> to vector<8x1xf32>
    %18 = vector.broadcast %17 : vector<8x1xf32> to vector<8x64xf32>
    %19 = arith.select %3, %16, %18 : vector<8x64xi1>, vector<8x64xf32>
    %20 = vector.shape_cast %14 : vector<8x1xf32> to vector<8x1xf32>
    %21 = vector.broadcast %20 : vector<8x1xf32> to vector<8x64xf32>
    %22 = vector.shape_cast %12 : vector<8x1xf32> to vector<8x1xf32>
    %23 = vector.broadcast %22 : vector<8x1xf32> to vector<8x64xf32>
    %24 = arith.select %3, %21, %23 : vector<8x64xi1>, vector<8x64xf32>
    %c0_i32 = arith.constant 0 : i32
    %25 = vector.broadcast %c0_i32 : i32 to vector<8x64xi32>
    %26 = arith.cmpi eq, %10, %25 : vector<8x64xi32>
    %27 = arith.select %26, %19, %24 : vector<8x64xi1>, vector<8x64xf32>
    %28 = arith.mulf %6, %27 : vector<8x64xf32>
    %c3_i32 = arith.constant 3 : i32
    %29 = vector.broadcast %c3_i32 : i32 to vector<8x64xi32>
    %30 = arith.shrsi %5, %29 : vector<8x64xi32>
    %c1_i32_1 = arith.constant 1 : i32
    %31 = vector.broadcast %c1_i32_1 : i32 to vector<8x64xi32>
    %32 = arith.andi %30, %31 : vector<8x64xi32>
    %33 = vector.extract_strided_slice %0 {offsets = [0, 1], sizes = [8, 1], strides = [1, 1]} : vector<8x20xf32> to vector<8x1xf32>
    %34 = vector.extract_strided_slice %0 {offsets = [0, 6], sizes = [8, 1], strides = [1, 1]} : vector<8x20xf32> to vector<8x1xf32>
    %35 = vector.extract_strided_slice %0 {offsets = [0, 11], sizes = [8, 1], strides = [1, 1]} : vector<8x20xf32> to vector<8x1xf32>
    %36 = vector.extract_strided_slice %0 {offsets = [0, 16], sizes = [8, 1], strides = [1, 1]} : vector<8x20xf32> to vector<8x1xf32>
    %37 = vector.shape_cast %35 : vector<8x1xf32> to vector<8x1xf32>
    %38 = vector.broadcast %37 : vector<8x1xf32> to vector<8x64xf32>
    %39 = vector.shape_cast %33 : vector<8x1xf32> to vector<8x1xf32>
    %40 = vector.broadcast %39 : vector<8x1xf32> to vector<8x64xf32>
    %41 = arith.select %3, %38, %40 : vector<8x64xi1>, vector<8x64xf32>
    %42 = vector.shape_cast %36 : vector<8x1xf32> to vector<8x1xf32>
    %43 = vector.broadcast %42 : vector<8x1xf32> to vector<8x64xf32>
    %44 = vector.shape_cast %34 : vector<8x1xf32> to vector<8x1xf32>
    %45 = vector.broadcast %44 : vector<8x1xf32> to vector<8x64xf32>
    %46 = arith.select %3, %43, %45 : vector<8x64xi1>, vector<8x64xf32>
    %c0_i32_2 = arith.constant 0 : i32
    %47 = vector.broadcast %c0_i32_2 : i32 to vector<8x64xi32>
    %48 = arith.cmpi eq, %32, %47 : vector<8x64xi32>
    %49 = arith.select %48, %41, %46 : vector<8x64xi1>, vector<8x64xf32>
    %50 = arith.mulf %28, %49 : vector<8x64xf32>
    %c2_i32 = arith.constant 2 : i32
    %51 = vector.broadcast %c2_i32 : i32 to vector<8x64xi32>
    %52 = arith.shrsi %5, %51 : vector<8x64xi32>
    %c1_i32_3 = arith.constant 1 : i32
    %53 = vector.broadcast %c1_i32_3 : i32 to vector<8x64xi32>
    %54 = arith.andi %52, %53 : vector<8x64xi32>
    %55 = vector.extract_strided_slice %0 {offsets = [0, 2], sizes = [8, 1], strides = [1, 1]} : vector<8x20xf32> to vector<8x1xf32>
    %56 = vector.extract_strided_slice %0 {offsets = [0, 7], sizes = [8, 1], strides = [1, 1]} : vector<8x20xf32> to vector<8x1xf32>
    %57 = vector.extract_strided_slice %0 {offsets = [0, 12], sizes = [8, 1], strides = [1, 1]} : vector<8x20xf32> to vector<8x1xf32>
    %58 = vector.extract_strided_slice %0 {offsets = [0, 17], sizes = [8, 1], strides = [1, 1]} : vector<8x20xf32> to vector<8x1xf32>
    %59 = vector.shape_cast %57 : vector<8x1xf32> to vector<8x1xf32>
    %60 = vector.broadcast %59 : vector<8x1xf32> to vector<8x64xf32>
    %61 = vector.shape_cast %55 : vector<8x1xf32> to vector<8x1xf32>
    %62 = vector.broadcast %61 : vector<8x1xf32> to vector<8x64xf32>
    %63 = arith.select %3, %60, %62 : vector<8x64xi1>, vector<8x64xf32>
    %64 = vector.shape_cast %58 : vector<8x1xf32> to vector<8x1xf32>
    %65 = vector.broadcast %64 : vector<8x1xf32> to vector<8x64xf32>
    %66 = vector.shape_cast %56 : vector<8x1xf32> to vector<8x1xf32>
    %67 = vector.broadcast %66 : vector<8x1xf32> to vector<8x64xf32>
    %68 = arith.select %3, %65, %67 : vector<8x64xi1>, vector<8x64xf32>
    %c0_i32_4 = arith.constant 0 : i32
    %69 = vector.broadcast %c0_i32_4 : i32 to vector<8x64xi32>
    %70 = arith.cmpi eq, %54, %69 : vector<8x64xi32>
    %71 = arith.select %70, %63, %68 : vector<8x64xi1>, vector<8x64xf32>
    %72 = arith.mulf %50, %71 : vector<8x64xf32>
    %c1_i32_5 = arith.constant 1 : i32
    %73 = vector.broadcast %c1_i32_5 : i32 to vector<8x64xi32>
    %74 = arith.shrsi %5, %73 : vector<8x64xi32>
    %c1_i32_6 = arith.constant 1 : i32
    %75 = vector.broadcast %c1_i32_6 : i32 to vector<8x64xi32>
    %76 = arith.andi %74, %75 : vector<8x64xi32>
    %77 = vector.extract_strided_slice %0 {offsets = [0, 3], sizes = [8, 1], strides = [1, 1]} : vector<8x20xf32> to vector<8x1xf32>
    %78 = vector.extract_strided_slice %0 {offsets = [0, 8], sizes = [8, 1], strides = [1, 1]} : vector<8x20xf32> to vector<8x1xf32>
    %79 = vector.extract_strided_slice %0 {offsets = [0, 13], sizes = [8, 1], strides = [1, 1]} : vector<8x20xf32> to vector<8x1xf32>
    %80 = vector.extract_strided_slice %0 {offsets = [0, 18], sizes = [8, 1], strides = [1, 1]} : vector<8x20xf32> to vector<8x1xf32>
    %81 = vector.shape_cast %79 : vector<8x1xf32> to vector<8x1xf32>
    %82 = vector.broadcast %81 : vector<8x1xf32> to vector<8x64xf32>
    %83 = vector.shape_cast %77 : vector<8x1xf32> to vector<8x1xf32>
    %84 = vector.broadcast %83 : vector<8x1xf32> to vector<8x64xf32>
    %85 = arith.select %3, %82, %84 : vector<8x64xi1>, vector<8x64xf32>
    %86 = vector.shape_cast %80 : vector<8x1xf32> to vector<8x1xf32>
    %87 = vector.broadcast %86 : vector<8x1xf32> to vector<8x64xf32>
    %88 = vector.shape_cast %78 : vector<8x1xf32> to vector<8x1xf32>
    %89 = vector.broadcast %88 : vector<8x1xf32> to vector<8x64xf32>
    %90 = arith.select %3, %87, %89 : vector<8x64xi1>, vector<8x64xf32>
    %c0_i32_7 = arith.constant 0 : i32
    %91 = vector.broadcast %c0_i32_7 : i32 to vector<8x64xi32>
    %92 = arith.cmpi eq, %76, %91 : vector<8x64xi32>
    %93 = arith.select %92, %85, %90 : vector<8x64xi1>, vector<8x64xf32>
    %94 = arith.mulf %72, %93 : vector<8x64xf32>
    %c0_i32_8 = arith.constant 0 : i32
    %95 = vector.broadcast %c0_i32_8 : i32 to vector<8x64xi32>
    %96 = arith.shrsi %5, %95 : vector<8x64xi32>
    %c1_i32_9 = arith.constant 1 : i32
    %97 = vector.broadcast %c1_i32_9 : i32 to vector<8x64xi32>
    %98 = arith.andi %96, %97 : vector<8x64xi32>
    %99 = vector.extract_strided_slice %0 {offsets = [0, 4], sizes = [8, 1], strides = [1, 1]} : vector<8x20xf32> to vector<8x1xf32>
    %100 = vector.extract_strided_slice %0 {offsets = [0, 9], sizes = [8, 1], strides = [1, 1]} : vector<8x20xf32> to vector<8x1xf32>
    %101 = vector.extract_strided_slice %0 {offsets = [0, 14], sizes = [8, 1], strides = [1, 1]} : vector<8x20xf32> to vector<8x1xf32>
    %102 = vector.extract_strided_slice %0 {offsets = [0, 19], sizes = [8, 1], strides = [1, 1]} : vector<8x20xf32> to vector<8x1xf32>
    %103 = vector.shape_cast %101 : vector<8x1xf32> to vector<8x1xf32>
    %104 = vector.broadcast %103 : vector<8x1xf32> to vector<8x64xf32>
    %105 = vector.shape_cast %99 : vector<8x1xf32> to vector<8x1xf32>
    %106 = vector.broadcast %105 : vector<8x1xf32> to vector<8x64xf32>
    %107 = arith.select %3, %104, %106 : vector<8x64xi1>, vector<8x64xf32>
    %108 = vector.shape_cast %102 : vector<8x1xf32> to vector<8x1xf32>
    %109 = vector.broadcast %108 : vector<8x1xf32> to vector<8x64xf32>
    %110 = vector.shape_cast %100 : vector<8x1xf32> to vector<8x1xf32>
    %111 = vector.broadcast %110 : vector<8x1xf32> to vector<8x64xf32>
    %112 = arith.select %3, %109, %111 : vector<8x64xi1>, vector<8x64xf32>
    %c0_i32_10 = arith.constant 0 : i32
    %113 = vector.broadcast %c0_i32_10 : i32 to vector<8x64xi32>
    %114 = arith.cmpi eq, %98, %113 : vector<8x64xi32>
    %115 = arith.select %114, %107, %112 : vector<8x64xi1>, vector<8x64xf32>
    %116 = arith.mulf %94, %115 : vector<8x64xf32>
    %c0_11 = arith.constant 0 : index
    %c0_12 = arith.constant 0 : index
    %117 = vector.load %arg2[%c0_11, %c0_12] : memref<64x128xf32, #tpu.memory_space<vmem>>, vector<64x128xf32>
    %cst_13 = arith.constant dense<0.000000e+00> : vector<8x128xf32>
    %118 = tpu.matmul %116, %117, %cst_13 {dimension_numbers = #tpu.dot_dimension_numbers<[1], [0], [0], [1], [0, 0, 1, 1], [], []>} : vector<8x64xf32>, vector<64x128xf32>, vector<8x128xf32> -> vector<8x128xf32>
    %119 = arith.mulf %118, %118 : vector<8x128xf32>
    %120 = vector.extract_strided_slice %119 {offsets = [0, 0], sizes = [8, 16], strides = [1, 1]} : vector<8x128xf32> to vector<8x16xf32>
    %cst_14 = arith.constant dense<0xFF800000> : vector<8xf32>
    %121 = vector.multi_reduction <maximumf>, %120, %cst_14 [1] : vector<8x16xf32> to vector<8xf32>
    %122 = vector.shape_cast %121 : vector<8xf32> to vector<8x1xf32>
    %cst_15 = arith.constant 9.99999996E-13 : f32
    %123 = vector.broadcast %cst_15 : f32 to vector<8x1xf32>
    %124 = arith.maximumf %122, %123 : vector<8x1xf32>
    %125 = tpu.reciprocal %124 {approx = true} : vector<8x1xf32> -> vector<8x1xf32>
    %126 = vector.broadcast %125 : vector<8x1xf32> to vector<8x16xf32>
    %127 = arith.mulf %120, %126 : vector<8x16xf32>
    %128 = vector.extract_strided_slice %119 {offsets = [0, 16], sizes = [8, 16], strides = [1, 1]} : vector<8x128xf32> to vector<8x16xf32>
    %cst_16 = arith.constant dense<0xFF800000> : vector<8xf32>
    %129 = vector.multi_reduction <maximumf>, %128, %cst_16 [1] : vector<8x16xf32> to vector<8xf32>
    %130 = vector.shape_cast %129 : vector<8xf32> to vector<8x1xf32>
    %cst_17 = arith.constant 9.99999996E-13 : f32
    %131 = vector.broadcast %cst_17 : f32 to vector<8x1xf32>
    %132 = arith.maximumf %130, %131 : vector<8x1xf32>
    %133 = tpu.reciprocal %132 {approx = true} : vector<8x1xf32> -> vector<8x1xf32>
    %134 = vector.broadcast %133 : vector<8x1xf32> to vector<8x16xf32>
    %135 = arith.mulf %128, %134 : vector<8x16xf32>
    %136 = vector.extract_strided_slice %119 {offsets = [0, 32], sizes = [8, 16], strides = [1, 1]} : vector<8x128xf32> to vector<8x16xf32>
    %cst_18 = arith.constant dense<0xFF800000> : vector<8xf32>
    %137 = vector.multi_reduction <maximumf>, %136, %cst_18 [1] : vector<8x16xf32> to vector<8xf32>
    %138 = vector.shape_cast %137 : vector<8xf32> to vector<8x1xf32>
    %cst_19 = arith.constant 9.99999996E-13 : f32
    %139 = vector.broadcast %cst_19 : f32 to vector<8x1xf32>
    %140 = arith.maximumf %138, %139 : vector<8x1xf32>
    %141 = tpu.reciprocal %140 {approx = true} : vector<8x1xf32> -> vector<8x1xf32>
    %142 = vector.broadcast %141 : vector<8x1xf32> to vector<8x16xf32>
    %143 = arith.mulf %136, %142 : vector<8x16xf32>
    %144 = vector.extract_strided_slice %119 {offsets = [0, 48], sizes = [8, 16], strides = [1, 1]} : vector<8x128xf32> to vector<8x16xf32>
    %cst_20 = arith.constant dense<0xFF800000> : vector<8xf32>
    %145 = vector.multi_reduction <maximumf>, %144, %cst_20 [1] : vector<8x16xf32> to vector<8xf32>
    %146 = vector.shape_cast %145 : vector<8xf32> to vector<8x1xf32>
    %cst_21 = arith.constant 9.99999996E-13 : f32
    %147 = vector.broadcast %cst_21 : f32 to vector<8x1xf32>
    %148 = arith.maximumf %146, %147 : vector<8x1xf32>
    %149 = tpu.reciprocal %148 {approx = true} : vector<8x1xf32> -> vector<8x1xf32>
    %150 = vector.broadcast %149 : vector<8x1xf32> to vector<8x16xf32>
    %151 = arith.mulf %144, %150 : vector<8x16xf32>
    %152 = vector.extract_strided_slice %119 {offsets = [0, 64], sizes = [8, 16], strides = [1, 1]} : vector<8x128xf32> to vector<8x16xf32>
    %cst_22 = arith.constant dense<0xFF800000> : vector<8xf32>
    %153 = vector.multi_reduction <maximumf>, %152, %cst_22 [1] : vector<8x16xf32> to vector<8xf32>
    %154 = vector.shape_cast %153 : vector<8xf32> to vector<8x1xf32>
    %cst_23 = arith.constant 9.99999996E-13 : f32
    %155 = vector.broadcast %cst_23 : f32 to vector<8x1xf32>
    %156 = arith.maximumf %154, %155 : vector<8x1xf32>
    %157 = tpu.reciprocal %156 {approx = true} : vector<8x1xf32> -> vector<8x1xf32>
    %158 = vector.broadcast %157 : vector<8x1xf32> to vector<8x16xf32>
    %159 = arith.mulf %152, %158 : vector<8x16xf32>
    %160 = vector.extract_strided_slice %119 {offsets = [0, 80], sizes = [8, 16], strides = [1, 1]} : vector<8x128xf32> to vector<8x16xf32>
    %cst_24 = arith.constant dense<0xFF800000> : vector<8xf32>
    %161 = vector.multi_reduction <maximumf>, %160, %cst_24 [1] : vector<8x16xf32> to vector<8xf32>
    %162 = vector.shape_cast %161 : vector<8xf32> to vector<8x1xf32>
    %cst_25 = arith.constant 9.99999996E-13 : f32
    %163 = vector.broadcast %cst_25 : f32 to vector<8x1xf32>
    %164 = arith.maximumf %162, %163 : vector<8x1xf32>
    %165 = tpu.reciprocal %164 {approx = true} : vector<8x1xf32> -> vector<8x1xf32>
    %166 = vector.broadcast %165 : vector<8x1xf32> to vector<8x16xf32>
    %167 = arith.mulf %160, %166 : vector<8x16xf32>
    %168 = vector.extract_strided_slice %119 {offsets = [0, 96], sizes = [8, 16], strides = [1, 1]} : vector<8x128xf32> to vector<8x16xf32>
    %cst_26 = arith.constant dense<0xFF800000> : vector<8xf32>
    %169 = vector.multi_reduction <maximumf>, %168, %cst_26 [1] : vector<8x16xf32> to vector<8xf32>
    %170 = vector.shape_cast %169 : vector<8xf32> to vector<8x1xf32>
    %cst_27 = arith.constant 9.99999996E-13 : f32
    %171 = vector.broadcast %cst_27 : f32 to vector<8x1xf32>
    %172 = arith.maximumf %170, %171 : vector<8x1xf32>
    %173 = tpu.reciprocal %172 {approx = true} : vector<8x1xf32> -> vector<8x1xf32>
    %174 = vector.broadcast %173 : vector<8x1xf32> to vector<8x16xf32>
    %175 = arith.mulf %168, %174 : vector<8x16xf32>
    %176 = vector.extract_strided_slice %119 {offsets = [0, 112], sizes = [8, 16], strides = [1, 1]} : vector<8x128xf32> to vector<8x16xf32>
    %cst_28 = arith.constant dense<0xFF800000> : vector<8xf32>
    %177 = vector.multi_reduction <maximumf>, %176, %cst_28 [1] : vector<8x16xf32> to vector<8xf32>
    %178 = vector.shape_cast %177 : vector<8xf32> to vector<8x1xf32>
    %cst_29 = arith.constant 9.99999996E-13 : f32
    %179 = vector.broadcast %cst_29 : f32 to vector<8x1xf32>
    %180 = arith.maximumf %178, %179 : vector<8x1xf32>
    %181 = tpu.reciprocal %180 {approx = true} : vector<8x1xf32> -> vector<8x1xf32>
    %182 = vector.broadcast %181 : vector<8x1xf32> to vector<8x16xf32>
    %183 = arith.mulf %176, %182 : vector<8x16xf32>
    %184 = tpu.concatenate %127, %135, %143, %151, %159, %167, %175, %183 in 1 : vector<8x16xf32>, vector<8x16xf32>, vector<8x16xf32>, vector<8x16xf32>, vector<8x16xf32>, vector<8x16xf32>, vector<8x16xf32>, vector<8x16xf32> -> vector<8x128xf32>
    %c0_30 = arith.constant 0 : index
    %c0_31 = arith.constant 0 : index
    %185 = vector.load %arg3[%c0_30, %c0_31] : memref<8x128xf32, #tpu.memory_space<vmem>>, vector<8x128xf32>
    tpu.vector_store %arg3[%c0_30, %c0_31], %184 {strides = array<i32>} : memref<8x128xf32, #tpu.memory_space<vmem>>, vector<8x128xf32>,
    return
  }
  func.func @transform_0(%arg0: i32) -> (i32, i32) {
    %c0_i32 = arith.constant 0 : i32
    %c0_i32_0 = arith.constant 0 : i32
    return %arg0, %c0_i32 : i32, i32
  }
  func.func @transform_1(%arg0: i32) -> (i32, i32) {
    %c0_i32 = arith.constant 0 : i32
    %c0_i32_0 = arith.constant 0 : i32
    %c0_i32_1 = arith.constant 0 : i32
    return %c0_i32, %c0_i32_0 : i32, i32
  }
  func.func @transform_2(%arg0: i32) -> (i32, i32) {
    %c0_i32 = arith.constant 0 : i32
    %c0_i32_0 = arith.constant 0 : i32
    return %arg0, %c0_i32 : i32, i32
  }
}

</mosaic_0001>

<bundles_post_ra>
// kernel: patch_quantum_generator.1
= control target key start
LH: loop header
LB: loop body
LE: loop exit
PB: predicated region body
PF: predicated region fallthrough
CT: control target
= control target key end

     0   :  { %v387_v0 = vmov 15   ;;  %v388_v1 = vmov 10   ;;  %v389_v3 = vmov 5   ;;  %v390_v4 = vmov 0   ;;  %s509_s0 = inlined_call_operand.vmem [shape: f32[8,20], index: 0, kind: input, shape index: {}]   ;;  %s510_s1 = inlined_call_operand.vmem [shape: f32[64,128], index: 1, kind: input, shape index: {}]   ;;  %s511_s2 = inlined_call_operand.vmem [shape: f32[8,128], index: 2, kind: output, shape index: {}]  }
   0x1   :  { %352 = vset.pattern.permute.xlu1 %v387_v0  ;;  %350 = vset.pattern.permute.xlu0 %v388_v1  ;;  %v428_v2 = vld [vmem:[%s509_s0] sm:$0xff]  ;;  %v391_v5 = vmov 11   ;;  %v392_v6 = vmov 1   ;;  %v393_v7 = vmov 16   ;;  %v394_v8 = vmov 12   ;;  %v131_v20 = vld [vmem:[%s510_s1 + $0x8] sm:$0xff] }
   0x2   :  { %29 = vperm.xlu1 %352, %v428_v2   ;;  %20 = vperm.xlu0 %350, %v428_v2   ;;  %v395_v9 = vmov 6   ;;  %v396_v10 = vmov 7   ;;  %v397_v11 = vmov 2   ;;  %v398_v12 = vmov 18   ;;  %v130_v19 = vld [vmem:[%s510_s1] sm:$0xff]  ;;  %v132_v24 = vld [vmem:[%s510_s1 + $0x10] sm:$0xff] }
   0x3   :  { %v399_v13 = vmov 17   ;;  %v400_v14 = vmov 4   ;;  %v401_v15 = vmov 13   ;;  %v402_v16 = vmov 9   ;;  %v133_v25 = vld [vmem:[%s510_s1 + $0x18] sm:$0xff]  ;;  %v134_v28 = vld [vmem:[%s510_s1 + $0x20] sm:$0xff] }
   0x4   :  { %v403_v17 = vmov 3   ;;  %v404_v18 = vmov 8   ;;  %v316_v21 = vpack.c.bf16 %v131_v20, %v130_v19  ;;  %v405_v22 = vmov 0.0|0.0   ;;  %v135_v29 = vld [vmem:[%s510_s1 + $0x28] sm:$0xff]  ;;  %v136_v31 = vld [vmem:[%s510_s1 + $0x30] sm:$0xff]  ;;  %v137_v32 = vld [vmem:[%s510_s1 + $0x38] sm:$0xff] }
   0x5   :  { %315 = vmatprep.subr.bf16.mxu0 %v405_v22  ;;  %v406_v23 = vmov 14   ;;  %v319_v26 = vpack.c.bf16 %v133_v25, %v132_v24  ;;  %v407_v27 = vmov 19   ;;  %v322_v30 = vpack.c.bf16 %v135_v29, %v134_v28 }
   0x6   :  { %353 = vset.pattern.permute.xlu1 %v389_v3  ;;  %351 = vset.pattern.permute.xlu0 %v390_v4  ;;  %v325_v33 = vpack.c.bf16 %v137_v32, %v136_v31  ;;  %vm408_vm0 = vmmov 0   ;;  %v409_v34 = vmov 0.0   ;;  %v12_v43 = vlaneseq }
   0x7   :  { %33 = vperm.xlu1 %353, %v428_v2   ;;  %24 = vperm.xlu0 %351, %v428_v2   ;;  %vm138_vm7 = vcmask 523264   ;;  %vm220_vm8 = vcmask 261248   ;;  %vm213_vm9 = vcmask 130048   ;;  %vm241_vm10 = vcmask 654848  }
   0x8   :  { %317 = vmatpush3.bf16.msra.mxu0 %v316_v21  ;;  %312 = vmatprep.mubr.msk.f32.mxu0 %vm408_vm0, %v409_v34  ;;  %v13_v46 = vand.u32 127, %v12_v43  ;;  %vm227_vm11 = vcmask 392448   ;;  %vm255_vm12 = vcmask 917248   ;;  %vm234_vm13 = vcmask 523648  }
   0x9   :  { %318 = vmatprep.subr.bf16.mxu0 %v405_v22  ;;  %vm248_vm14 = vcmask 786048   ;;  %vm262_vm15 = vcmask 1048448   ;;  %vm270_vm0 = vcmask 261120  }
   0xa   :  { %v15_v48 = vand.u32 31, %v13_v46  ;;  %vm14_vm1 = vcmp.ge.s32.totalorder %v13_v46, 32 }
   0xb   :  { %354 = vset.pattern.permute.xlu1 %v391_v5  ;;  %355 = vset.pattern.permute.xlu0 %v392_v6 }
   0xc   :  { %42 = vperm.xlu1 %354, %v428_v2   ;;  %46 = vperm.xlu0 %355, %v428_v2   ;;  %v39_v51 = vshra.s32 %v15_v48, 3  ;;  %v16_v52 = vshra.s32 %v15_v48, 4  ;;  %v62_v53 = vshra.s32 %v15_v48, 2  ;;  %v85_v56 = vshra.s32 %v15_v48, 1 }
   0xd   :  { %320 = vmatpush3.bf16.msra.mxu0 %v319_v26 }
   0xe   :  { %321 = vmatprep.subr.bf16.mxu0 %v405_v22  ;;  %v40_v55 = vand.u32 1, %v39_v51  ;;  %v17_v57 = vand.u32 1, %v16_v52  ;;  %v63_v58 = vand.u32 1, %v62_v53  ;;  %v86_v62 = vand.u32 1, %v85_v56 }
  0x10   :  { %356 = vset.pattern.permute.xlu1 %v393_v7  ;;  %358 = vset.pattern.permute.xlu0 %v394_v8  ;;  %vm59_vm2 = vcmp.eq.s32.totalorder %v40_v55, 0  ;;  %vm37_vm3 = vcmp.eq.s32.totalorder %v17_v57, 0  ;;  %vm82_vm4 = vcmp.eq.s32.totalorder %v63_v58, 0  ;;  %vm105_vm5 = vcmp.eq.s32.totalorder %v86_v62, 0 }
  0x11   :  { %51 = vperm.xlu1 %356, %v428_v2   ;;  %65 = vperm.xlu0 %358, %v428_v2   ;;  %v108_v8 = vand.u32 1, %v15_v48 }
  0x12   :  { %323 = vmatpush3.bf16.msra.mxu0 %v322_v30 }
  0x13   :  { %324 = vmatprep.subr.bf16.mxu0 %v405_v22  ;;  %vm127_vm6 = vcmp.eq.s32.totalorder %v108_v8, 0 }
  0x15   :  { %357 = vset.pattern.permute.xlu1 %v395_v9  ;;  %361 = vset.pattern.permute.xlu0 %v396_v10 }
  0x16   :  { %55 = vperm.xlu1 %357, %v428_v2   ;;  %78 = vperm.xlu0 %361, %v428_v2  }
  0x17   :  { %326 = vmatpush3.bf16.msra.mxu0 %v325_v33 }
  0x1a   :  { %359 = vset.pattern.permute.xlu1 %v397_v11  ;;  %364 = vset.pattern.permute.xlu0 %v398_v12 }
  0x1b   :  { %69 = vperm.xlu1 %359, %v428_v2   ;;  %97 = vperm.xlu0 %364, %v428_v2  }
  0x1f   :  { %360 = vset.pattern.permute.xlu1 %v399_v13  ;;  %367 = vset.pattern.permute.xlu0 %v400_v14 }
  0x20   :  { %74 = vperm.xlu1 %360, %v428_v2   ;;  %114 = vperm.xlu0 %367, %v428_v2  }
  0x24   :  { %362 = vset.pattern.permute.xlu1 %v401_v15  ;;  %370 = vset.pattern.permute.xlu0 %v402_v16 }
  0x25   :  { %88 = vperm.xlu1 %362, %v428_v2  }
  0x29   :  { %363 = vset.pattern.permute.xlu1 %v403_v17 }
  0x2a   :  { %92 = vperm.xlu1 %363, %v428_v2  }
  0x2e   :  { %365 = vset.pattern.permute.xlu1 %v404_v18 }
  0x2f   :  { %101 = vperm.xlu1 %365, %v428_v2  }
  0x33   :  { %366 = vset.pattern.permute.xlu1 %v406_v23 }
  0x34   :  { %110 = vperm.xlu1 %366, %v428_v2  }
  0x38   :  { %368 = vset.pattern.permute.xlu1 %v407_v27 }
  0x39   :  { %119 = vperm.xlu1 %368, %v428_v2  }
  0x3d   :  { %369 = vset.pattern.permute.xlu1 %v402_v16 }
  0x3e   :  { %123 = vperm.xlu1 %369, %v428_v2  }
  0x81   :  { %v30_v35 = vpop.permute.xlu1 %29  ;;  %v21_v41 = vpop.permute.xlu0 %20 }
  0x86   :  { %v34_v36 = vpop.permute.xlu1 %33  ;;  %v25_v44 = vpop.permute.xlu0 %24 }
  0x87   :  { %v36_v0 = vsel %vm14_vm1, %v30_v35, %v34_v36  ;;  %v27_v1 = vsel %vm14_vm1, %v21_v41, %v25_v44 }
  0x88   :  { %v38_v9 = vsel %vm37_vm3, %v27_v1, %v36_v0  ;;  %vm277_vm3 = vcmask 785408  }
  0x8b   :  { %v43_v37 = vpop.permute.xlu1 %42  ;;  %v47_v47 = vpop.permute.xlu0 %46 }
  0x8c   :  { %v49_v2 = vsel %vm14_vm1, %v43_v37, %v47_v47 }
  0x90   :  { %v52_v38 = vpop.permute.xlu1 %51  ;;  %v66_v50 = vpop.permute.xlu0 %65 }
  0x95   :  { %v56_v39 = vpop.permute.xlu1 %55  ;;  %v79_v59 = vpop.permute.xlu0 %78 }
  0x96   :  { %v58_v61 = vsel %vm14_vm1, %v52_v38, %v56_v39 }
  0x97   :  { %v60_v4 = vsel %vm59_vm2, %v49_v2, %v58_v61  ;;  %vm275_vm2 = vcmask 654336  }
  0x98   :  { %v61_v11 = vmul.f32 %v60_v4, %v38_v9 }
  0x9a   :  { %v70_v40 = vpop.permute.xlu1 %69  ;;  %v98_v63 = vpop.permute.xlu0 %97 }
  0x9b   :  { %v72_v5 = vsel %vm14_vm1, %v66_v50, %v70_v40 }
  0x9f   :  { %v75_v42 = vpop.permute.xlu1 %74  ;;  %v115_v14 = vpop.permute.xlu0 %114 }
  0xa0   :  { %v81_v3 = vsel %vm14_vm1, %v75_v42, %v79_v59 }
  0xa1   :  { %v83_v10 = vsel %vm82_vm4, %v72_v5, %v81_v3  ;;  %vm279_vm4 = vcmask 916480  }
  0xa2   :  { %v84_v15 = vmul.f32 %v83_v10, %v61_v11 }
  0xa4   :  { %v89_v45 = vpop.permute.xlu1 %88 }
  0xa9   :  { %v93_v49 = vpop.permute.xlu1 %92 }
  0xaa   :  { %v95_v12 = vsel %vm14_vm1, %v89_v45, %v93_v49 }
  0xae   :  { %v102_v54 = vpop.permute.xlu1 %101 }
  0xaf   :  { %v104_v6 = vsel %vm14_vm1, %v98_v63, %v102_v54 }
  0xb0   :  { %v106_v13 = vsel %vm105_vm5, %v95_v12, %v104_v6 }
  0xb1   :  { %v107_v17 = vmul.f32 %v106_v13, %v84_v15 }
  0xb3   :  { %v111_v60 = vpop.permute.xlu1 %110 }
  0xb4   :  { %v117_v18 = vsel %vm14_vm1, %v111_v60, %v115_v14 }
  0xb8   :  { %v120_v7 = vpop.permute.xlu1 %119 }
  0xbd   :  { %v124_v16 = vpop.permute.xlu1 %123 }
  0xbe   :  { %v126_v19 = vsel %vm14_vm1, %v120_v7, %v124_v16  ;;  %vm272_vm1 = vcmask 392192  }
  0xbf   :  { %v128_v20 = vsel %vm127_vm6, %v117_v18, %v126_v19 }
  0xc0   :  { %v129_v21 = vmul.f32 %v128_v20, %v107_v17 }
  0xc2   :  { %313 = vmatmul.mubr.msk.f32.vlgmr.msra.gmra.mrb[0].mxu0 %vm138_vm7, %v129_v21 }
 0x195   :  { %v208_v22 = vpop.f32.mrb[0].mxu0 }
 0x196   :  { %v485_v23 = vmul.f32 %v208_v22, %v208_v22  ;;  %v314_v24 = vpop.f32.mrb[1].mxu0 }
 0x198   :  { %v221_v25 = vsel %vm220_vm8, %v485_v23, -inf  ;;  %v214_v26 = vsel %vm213_vm9, %v485_v23, -inf  ;;  %v242_v27 = vsel %vm241_vm10, %v485_v23, -inf  ;;  %v228_v28 = vsel %vm227_vm11, %v485_v23, -inf }
 0x199   :  { %222 = vmax.xlane.f32.xlu1 %v221_v25  ;;  %215 = vmax.xlane.f32.xlu0 %v214_v26  ;;  %v256_v29 = vsel %vm255_vm12, %v485_v23, -inf  ;;  %v235_v30 = vsel %vm234_vm13, %v485_v23, -inf  ;;  %v249_v31 = vsel %vm248_vm14, %v485_v23, -inf  ;;  %v263_v32 = vsel %vm262_vm15, %v485_v23, -inf }
 0x19d   :  { %243 = vmax.xlane.f32.xlu1 %v242_v27  ;;  %229 = vmax.xlane.f32.xlu0 %v228_v28 }
 0x1a1   :  { %257 = vmax.xlane.f32.xlu1 %v256_v29  ;;  %236 = vmax.xlane.f32.xlu0 %v235_v30 }
 0x1a5   :  { %250 = vmax.xlane.f32.xlu0 %v249_v31 }
 0x1a9   :  { %264 = vmax.xlane.f32.xlu0 %v263_v32 }
 0x226   :  { %v223_v33 = vpop.xlane.xlu1 %222  ;;  %v216_v34 = vpop.xlane.xlu0 %215 }
 0x227   :  { %v224_v35 = vmax.f32 %v223_v33, 1e-12  ;;  %v217_v36 = vmax.f32 %v216_v34, 1e-12 }
 0x229   :  { %371 = vrcp.f32 %v224_v35 }
 0x22a   :  { %v244_v37 = vpop.xlane.xlu1 %243  ;;  %v230_v38 = vpop.xlane.xlu0 %229  ;;  %373 = vrcp.f32 %v217_v36 }
 0x22b   :  { %v231_v39 = vmax.f32 %v230_v38, 1e-12  ;;  %v245_v40 = vmax.f32 %v244_v37, 1e-12 }
 0x22d   :  { %375 = vrcp.f32 %v231_v39 }
 0x22e   :  { %v237_v41 = vpop.xlane.xlu0 %236  ;;  %v258_v42 = vpop.xlane.xlu1 %257  ;;  %377 = vrcp.f32 %v245_v40 }
 0x22f   :  { %v238_v43 = vmax.f32 %v237_v41, 1e-12  ;;  %v259_v44 = vmax.f32 %v258_v42, 1e-12 }
 0x231   :  { %379 = vrcp.f32 %v238_v43 }
 0x232   :  { %v251_v45 = vpop.xlane.xlu0 %250 }
 0x233   :  { %v252_v46 = vmax.f32 %v251_v45, 1e-12  ;;  %v372_v47 = vpop.eup %371 }
 0x234   :  { %v374_v48 = vpop.eup %373  ;;  %v226_v52 = vmul.f32 %v372_v47, %v485_v23 }
 0x235   :  { %381 = vrcp.f32 %v252_v46  ;;  %v219_v53 = vmul.f32 %v374_v48, %v485_v23 }
 0x236   :  { %383 = vrcp.f32 %v259_v44  ;;  %v265_v49 = vpop.xlane.xlu0 %264 }
 0x237   :  { %v266_v50 = vmax.f32 %v265_v49, 1e-12  ;;  %v376_v51 = vpop.eup %375  ;;  %v269_v57 = vsel %vm213_vm9, %v219_v53, %v226_v52 }
 0x238   :  { %v233_v54 = vmul.f32 %v376_v51, %v485_v23  ;;  %v378_v55 = vpop.eup %377 }
 0x239   :  { %385 = vrcp.f32 %v266_v50  ;;  %v247_v61 = vmul.f32 %v378_v55, %v485_v23 }
 0x23a   :  { %v271_v59 = vsel %vm270_vm0, %v269_v57, %v233_v54 }
 0x23b   :  { %v380_v56 = vpop.eup %379 }
 0x23c   :  { %v240_v58 = vmul.f32 %v380_v56, %v485_v23 }
 0x23e   :  { %v273_v62 = vsel %vm272_vm1, %v271_v59, %v240_v58 }
 0x23f   :  { %v382_v60 = vpop.eup %381  ;;  %v274_v1 = vsel %vm138_vm7, %v273_v62, %v247_v61 }
 0x240   :  { %v384_v63 = vpop.eup %383  ;;  %v254_v0 = vmul.f32 %v382_v60, %v485_v23 }
 0x241   :  { %v261_v4 = vmul.f32 %v384_v63, %v485_v23 }
 0x242   :  { %v276_v2 = vsel %vm275_vm2, %v274_v1, %v254_v0 }
 0x243   :  { %v386_v3 = vpop.eup %385  ;;  %v278_v6 = vsel %vm277_vm3, %v276_v2, %v261_v4 }
 0x244   :  { %v268_v5 = vmul.f32 %v386_v3, %v485_v23 }
 0x246   :  { %v280_v7 = vsel %vm279_vm4, %v278_v6, %v268_v5 }
 0x247   :  { %281 = vst [vmem:[%s511_s2] sm:$0xff] %v280_v7 }

</bundles_post_ra>
